<compile_context>
chip_gen: v7x
topology: tpu7x:2x2x1
jax: 0.10.0
libtpu: 0.0.40
codegen_flags: <defaults>
</compile_context>

<pallas_src>
import functools

import jax
import jax.numpy as jnp
from jax.experimental import pallas as pl
from jax.experimental.pallas import tpu as pltpu


# ---------------------------------------------------------------------------
# Fused Pallas kernel
# ---------------------------------------------------------------------------
def _up_double_conv_kernel(x1_ref, x2_ref, u2t_ref, masks_ref,
                           w1_ref, s1_ref, b1_ref,
                           w2_ref, s2_ref, b2_ref,
                           o_ref, *, height, width):
    # x1_ref:    (1, C1, Hi*Wi)   coarse features, spatial flattened
    # x2_ref:    (1, C2, H*W)     skip features, spatial flattened
    # u2t_ref:   (Hi*Wi, H*W)     bilinear-upsample + zero-pad matrix
    # masks_ref: (9, H*W)         boundary masks for the nine 3x3 taps
    # w*_ref:    (Cout, 9*Cin)    conv weight, tap-major columns
    # s*/b*_ref: (Cout, 1)        folded BatchNorm scale / shift (incl. bias)
    # o_ref:     (1, Cout, H*W)
    hw = height * width

    # Bilinear x2 upsample (align_corners=True) + zero-pad of x1: one matmul.
    x1_up = jnp.dot(x1_ref[0].astype(jnp.float32), u2t_ref[...],
                    preferred_element_type=jnp.float32)            # (C1, H*W)

    # Channel concat [x2, x1] entirely on-chip (never materialized in HBM).
    xin = jnp.concatenate([x2_ref[0].astype(jnp.float32), x1_up], axis=0)

    def conv3x3_bn_relu(src, w_mat, scale, shift):
        # src: (C, H*W) channels-first, spatial lane-dense.  Each 3x3 tap is a
        # lane rotation (pltpu.roll) + boundary mask; the 9 taps form one
        # im2col matrix so the whole conv is a single MXU matmul.
        taps = []
        for kdy in range(3):
            for kdx in range(3):
                shift_flat = (kdy - 1) * width + (kdx - 1)
                tap_idx = 3 * kdy + kdx
                if shift_flat == 0:
                    taps.append(src)
                else:
                    rolled = pltpu.roll(src, (-shift_flat) % hw, axis=1)
                    taps.append(rolled * masks_ref[tap_idx:tap_idx + 1, :])
        patches = jnp.concatenate(taps, axis=0)                    # (9C, H*W)
        y = jnp.dot(w_mat, patches, preferred_element_type=jnp.float32)
        return jnp.maximum(y * scale + shift, 0.0)                 # (Cout, H*W)

    y1 = conv3x3_bn_relu(xin, w1_ref[...], s1_ref[...], b1_ref[...])
    y2 = conv3x3_bn_relu(y1, w2_ref[...], s2_ref[...], b2_ref[...])
    o_ref[0] = y2.astype(o_ref.dtype)


# ---------------------------------------------------------------------------
# Host-side helpers (tiny, static, computed once per shape)
# ---------------------------------------------------------------------------
def _fold_bn(conv_bias, gamma, beta, running_mean, running_var, eps=1e-5):
    """Fold (conv bias + eval-mode BatchNorm) into per-channel scale/shift."""
    scale = gamma / jnp.sqrt(running_var + eps)
    shift = beta + (conv_bias - running_mean) * scale
    return scale, shift


def _upsample_pad_matrix(size_in, size_out, total, pad_before):
    """(total, size_in) matrix: bilinear x2 upsample (align_corners=True) of a
    length-`size_in` axis to `size_out`, placed at offset `pad_before` inside a
    zero-padded length-`total` axis (implements F.pad)."""
    if size_in == 1:
        core = jnp.ones((size_out, 1), jnp.float32)
    else:
        src = jnp.arange(size_out, dtype=jnp.float32) * (size_in - 1) / (size_out - 1)
        i0 = jnp.floor(src).astype(jnp.int32)
        i1 = jnp.minimum(i0 + 1, size_in - 1)
        frac = src - i0.astype(jnp.float32)
        rows = jnp.arange(size_out)
        core = jnp.zeros((size_out, size_in), jnp.float32)
        core = core.at[rows, i0].add(1.0 - frac).at[rows, i1].add(frac)
    m = jnp.zeros((total, size_in), jnp.float32)
    return m.at[pad_before:pad_before + size_out, :].set(core)


def _tap_masks(h, w):
    """(9, H*W) f32 masks zeroing taps that fall outside the zero-padding."""
    yy, xx = jnp.meshgrid(jnp.arange(h), jnp.arange(w), indexing="ij")
    yy = yy.reshape(1, h * w)
    xx = xx.reshape(1, h * w)
    rows = []
    for dy in (-1, 0, 1):
        for dx in (-1, 0, 1):
            ok = ((yy + dy >= 0) & (yy + dy < h) &
                  (xx + dx >= 0) & (xx + dx < w))
            rows.append(ok)
    return jnp.concatenate(rows, axis=0).astype(jnp.float32)


# ---------------------------------------------------------------------------
# Up.forward (public API: PyTorch-style NCHW in, NCHW out)
# ---------------------------------------------------------------------------
def up_forward(params, x1_nchw, x2_nchw):
    n, c1, hi, wi = x1_nchw.shape
    n2, c2, h, w = x2_nchw.shape
    assert n == n2
    ho, wo = 2 * hi, 2 * wi
    diff_y, diff_x = h - ho, w - wo
    assert diff_y >= 0 and diff_x >= 0
    hw = h * w
    cin = c1 + c2

    w1_oihw = params["w1"]
    w2_oihw = params["w2"]
    cmid = w1_oihw.shape[0]
    cout = w2_oihw.shape[0]
    assert w1_oihw.shape[1] == cin and w2_oihw.shape[1] == cmid

    # Fold (bias + eval-mode BatchNorm) into per-channel scale/shift.
    s1, b1 = _fold_bn(params["b1"], params["bn1_gamma"], params["bn1_beta"],
                      params["bn1_mean"], params["bn1_var"])
    s2, b2 = _fold_bn(params["b2"], params["bn2_gamma"], params["bn2_beta"],
                      params["bn2_mean"], params["bn2_var"])

    # Conv weights as (Cout, 9*Cin); column = (3*ky+kx)*Cin + ci (tap-major).
    w1_mat = jnp.transpose(w1_oihw, (0, 2, 3, 1)).reshape(cmid, 9 * cin)
    w2_mat = jnp.transpose(w2_oihw, (0, 2, 3, 1)).reshape(cout, 9 * cmid)

    # Combined bilinear-upsample + F.pad placement as one (Hi*Wi, H*W) matrix.
    mh = _upsample_pad_matrix(hi, ho, h, diff_y // 2)
    mw = _upsample_pad_matrix(wi, wo, w, diff_x // 2)
    u2t = jnp.kron(mh, mw).T                      # (Hi*Wi, H*W)

    # Shared 3x3 boundary masks.
    masks = _tap_masks(h, w)                      # (9, H*W)

    # NCHW -> channels-first with flat spatial (free reshapes, no transpose).
    x1f = x1_nchw.reshape(n, c1, hi * wi)
    x2f = x2_nchw.reshape(n, c2, hw)

    kernel = functools.partial(_up_double_conv_kernel, height=h, width=w)

    out = pl.pallas_call(
        kernel,
        out_shape=jax.ShapeDtypeStruct((n, cout, hw), x2_nchw.dtype),
        grid=(n,),
        in_specs=[
            pl.BlockSpec((1, c1, hi * wi), lambda i: (i, 0, 0)),
            pl.BlockSpec((1, c2, hw), lambda i: (i, 0, 0)),
            pl.BlockSpec((hi * wi, hw), lambda i: (0, 0)),
            pl.BlockSpec((9, hw), lambda i: (0, 0)),
            pl.BlockSpec((cmid, 9 * cin), lambda i: (0, 0)),
            pl.BlockSpec((cmid, 1), lambda i: (0, 0)),
            pl.BlockSpec((cmid, 1), lambda i: (0, 0)),
            pl.BlockSpec((cout, 9 * cmid), lambda i: (0, 0)),
            pl.BlockSpec((cout, 1), lambda i: (0, 0)),
            pl.BlockSpec((cout, 1), lambda i: (0, 0)),
        ],
        out_specs=pl.BlockSpec((1, cout, hw), lambda i: (i, 0, 0)),
        compiler_params=pltpu.CompilerParams(
            dimension_semantics=("parallel",),
            vmem_limit_bytes=32 * 1024 * 1024),
    )(x1f, x2f, u2t, masks,
      w1_mat, s1.reshape(cmid, 1), b1.reshape(cmid, 1),
      w2_mat, s2.reshape(cout, 1), b2.reshape(cout, 1))

    # Output is already NCHW with spatial flattened: free reshape.
    return out.reshape(n, cout, h, w)


# ---------------------------------------------------------------------------
# Pure-JAX reference (for correctness check only)
# ---------------------------------------------------------------------------
def _reference_up_forward(params, x1, x2, eps=1e-5):
    def upsample2x_ac(x):  # NCHW, bilinear, align_corners=True
        def interp(arr, axis, size_in):
            size_out = 2 * size_in
            if size_in == 1:
                return jnp.repeat(arr, size_out, axis=axis)
            src = jnp.arange(size_out, dtype=jnp.float32) * (size_in - 1) / (size_out - 1)
            i0 = jnp.floor(src).astype(jnp.int32)
            i1 = jnp.minimum(i0 + 1, size_in - 1)
            frac = src - i0.astype(jnp.float32)
            a0 = jnp.take(arr, i0, axis=axis)
            a1 = jnp.take(arr, i1, axis=axis)
            shp = [1] * arr.ndim
            shp[axis] = size_out
            f = frac.reshape(shp)
            return a0 * (1.0 - f) + a1 * f
        x = interp(x, 2, x.shape[2])
        x = interp(x, 3, x.shape[3])
        return x

    def conv_bn_relu(x, wgt, bias, gamma, beta, mean, var):
        y = jax.lax.conv_general_dilated(
            x, wgt, window_strides=(1, 1), padding=((1, 1), (1, 1)),
            dimension_numbers=("NCHW", "OIHW", "NCHW"),
            precision=jax.lax.Precision.HIGHEST)
        y = y + bias.reshape(1, -1, 1, 1)
        y = (y - mean.reshape(1, -1, 1, 1)) / jnp.sqrt(var.reshape(1, -1, 1, 1) + eps)
        y = y * gamma.reshape(1, -1, 1, 1) + beta.reshape(1, -1, 1, 1)
        return jnp.maximum(y, 0.0)

    x1u = upsample2x_ac(x1)
    dy = x2.shape[2] - x1u.shape[2]
    dx = x2.shape[3] - x1u.shape[3]
    x1u = jnp.pad(x1u, ((0, 0), (0, 0),
                        (dy // 2, dy - dy // 2), (dx // 2, dx - dx // 2)))
    x = jnp.concatenate([x2, x1u], axis=1)
    x = conv_bn_relu(x, params["w1"], params["b1"], params["bn1_gamma"],
                     params["bn1_beta"], params["bn1_mean"], params["bn1_var"])
    x = conv_bn_relu(x, params["w2"], params["b2"], params["bn2_gamma"],
                     params["bn2_beta"], params["bn2_mean"], params["bn2_var"])
    return x


# ---------------------------------------------------------------------------
# Parameter init (PyTorch Conv2d weight layout: (Cout, Cin, 3, 3))
# ---------------------------------------------------------------------------
def init_params(key, in_channels, out_channels):
    ks = jax.random.split(key, 12)
    return {
        "w1": 0.1 * jax.random.normal(ks[0], (out_channels, in_channels, 3, 3), jnp.float32),
        "b1": 0.05 * jax.random.normal(ks[1], (out_channels,), jnp.float32),
        "w2": 0.1 * jax.random.normal(ks[2], (out_channels, out_channels, 3, 3), jnp.float32),
        "b2": 0.05 * jax.random.normal(ks[3], (out_channels,), jnp.float32),
        # BatchNorm (eval mode) parameters / running stats
        "bn1_gamma": 1.0 + 0.1 * jax.random.normal(ks[4], (out_channels,), jnp.float32),
        "bn1_beta": 0.1 * jax.random.normal(ks[5], (out_channels,), jnp.float32),
        "bn1_mean": 0.1 * jax.random.normal(ks[6], (out_channels,), jnp.float32),
        "bn1_var": 0.5 + jax.random.uniform(ks[7], (out_channels,), jnp.float32),
        "bn2_gamma": 1.0 + 0.1 * jax.random.normal(ks[8], (out_channels,), jnp.float32),
        "bn2_beta": 0.1 * jax.random.normal(ks[9], (out_channels,), jnp.float32),
        "bn2_mean": 0.1 * jax.random.normal(ks[10], (out_channels,), jnp.float32),
        "bn2_var": 0.5 + jax.random.uniform(ks[11], (out_channels,), jnp.float32),
    }


if __name__ == "__main__":
    # Up(in_channels=8, out_channels=4, bilinear=True)
    # x1: coarse feature map (N, 4, 8, 8) -> upsampled to 16x16
    # x2: skip connection   (N, 4, 16, 16)
    N, C_SKIP, H, W = 2, 4, 16, 16
    in_channels, out_channels = 2 * C_SKIP, 4

    key = jax.random.PRNGKey(0)
    k_x1, k_x2, k_p = jax.random.split(key, 3)
    x1 = jax.random.normal(k_x1, (N, C_SKIP, H // 2, W // 2), jnp.float32)
    x2 = jax.random.normal(k_x2, (N, C_SKIP, H, W), jnp.float32)
    params = init_params(k_p, in_channels, out_channels)

    fwd = jax.jit(functools.partial(up_forward, params))
    out = jax.block_until_ready(fwd(x1, x2))
    assert out.shape == (N, out_channels, H, W), out.shape

    ref = jax.block_until_ready(
        jax.jit(functools.partial(_reference_up_forward, params))(x1, x2))
    max_err = float(jnp.max(jnp.abs(out - ref)))
    assert max_err < 2e-3, f"max abs error vs reference: {max_err}"

    print("KERNEL_OK")
</pallas_src>

<mosaic_0001>
module attributes {stable_mosaic.version = 11 : i64} {
  func.func private @main(%arg0: i32) attributes {dimension_semantics = [#tpu.dimension_semantics<core_parallel>], iteration_bounds = array<i64: 2>, tpu.core_type = #tpu.core_type<sc_scalar_subcore>, window_params = []} {
    return
  }
}

module attributes {stable_mosaic.version = 11 : i64} {
  func.func private @main(%arg0: i32) attributes {dimension_semantics = [#tpu.dimension_semantics<core_parallel>], iteration_bounds = array<i64: 2>, tpu.core_type = #tpu.core_type<sc_scalar_subcore>, window_params = []} {
    return
  }
}

module attributes {stable_mosaic.version = 11 : i64} {
  func.func @_up_double_conv_kernel(%arg0: i32, %arg1: memref<1x4x64xf32, #tpu.memory_space<vmem>>, %arg2: memref<1x4x256xf32, #tpu.memory_space<vmem>>, %arg3: memref<64x256xf32, #tpu.memory_space<vmem>>, %arg4: memref<9x256xf32, #tpu.memory_space<vmem>>, %arg5: memref<4x72xf32, #tpu.memory_space<vmem>>, %arg6: memref<4x1xf32, #tpu.memory_space<vmem>>, %arg7: memref<4x1xf32, #tpu.memory_space<vmem>>, %arg8: memref<4x36xf32, #tpu.memory_space<vmem>>, %arg9: memref<4x1xf32, #tpu.memory_space<vmem>>, %arg10: memref<4x1xf32, #tpu.memory_space<vmem>>, %arg11: memref<1x4x256xf32, #tpu.memory_space<vmem>>) attributes {dimension_semantics = [#tpu.dimension_semantics<parallel>], iteration_bounds = array<i64: 2>, scalar_prefetch = 0 : i64, scratch_operands = 0 : i64, tpu.core_type = #tpu.core_type<tc>, window_params = [{transform_indices = @transform_0, window_bounds = array<i64: 1, 4, 64>}, {transform_indices = @transform_1, window_bounds = array<i64: 1, 4, 256>}, {pipeline_mode = #tpu.pipeline_mode<synchronous>, transform_indices = @transform_2, window_bounds = array<i64: 64, 256>}, {pipeline_mode = #tpu.pipeline_mode<synchronous>, transform_indices = @transform_3, window_bounds = array<i64: 9, 256>}, {pipeline_mode = #tpu.pipeline_mode<synchronous>, transform_indices = @transform_4, window_bounds = array<i64: 4, 72>}, {pipeline_mode = #tpu.pipeline_mode<synchronous>, transform_indices = @transform_5, window_bounds = array<i64: 4, 1>}, {pipeline_mode = #tpu.pipeline_mode<synchronous>, transform_indices = @transform_6, window_bounds = array<i64: 4, 1>}, {pipeline_mode = #tpu.pipeline_mode<synchronous>, transform_indices = @transform_7, window_bounds = array<i64: 4, 36>}, {pipeline_mode = #tpu.pipeline_mode<synchronous>, transform_indices = @transform_8, window_bounds = array<i64: 4, 1>}, {pipeline_mode = #tpu.pipeline_mode<synchronous>, transform_indices = @transform_9, window_bounds = array<i64: 4, 1>}, {transform_indices = @transform_10, window_bounds = array<i64: 1, 4, 256>}]} {
    %c0 = arith.constant 0 : index
    %c0_0 = arith.constant 0 : index
    %c0_1 = arith.constant 0 : index
    %0 = vector.load %arg1[%c0, %c0_0, %c0_1] : memref<1x4x64xf32, #tpu.memory_space<vmem>>, vector<1x4x64xf32>
    %1 = vector.shape_cast %0 : vector<1x4x64xf32> to vector<4x64xf32>
    %c0_2 = arith.constant 0 : index
    %c0_3 = arith.constant 0 : index
    %2 = vector.load %arg3[%c0_2, %c0_3] : memref<64x256xf32, #tpu.memory_space<vmem>>, vector<64x256xf32>
    %cst = arith.constant dense<0.000000e+00> : vector<4x256xf32>
    %3 = tpu.matmul %1, %2, %cst {dimension_numbers = #tpu.dot_dimension_numbers<[1], [0], [0], [1], [0, 0, 1, 1], [], []>} : vector<4x64xf32>, vector<64x256xf32>, vector<4x256xf32> -> vector<4x256xf32>
    %c0_4 = arith.constant 0 : index
    %c0_5 = arith.constant 0 : index
    %c0_6 = arith.constant 0 : index
    %4 = vector.load %arg2[%c0_4, %c0_5, %c0_6] : memref<1x4x256xf32, #tpu.memory_space<vmem>>, vector<1x4x256xf32>
    %5 = vector.shape_cast %4 : vector<1x4x256xf32> to vector<4x256xf32>
    %6 = tpu.concatenate %5, %3 in 0 : vector<4x256xf32>, vector<4x256xf32> -> vector<8x256xf32>
    %c0_7 = arith.constant 0 : index
    %c0_8 = arith.constant 0 : index
    %7 = vector.load %arg5[%c0_7, %c0_8] : memref<4x72xf32, #tpu.memory_space<vmem>>, vector<4x72xf32>
    %c0_9 = arith.constant 0 : index
    %c0_10 = arith.constant 0 : index
    %8 = vector.load %arg6[%c0_9, %c0_10] : memref<4x1xf32, #tpu.memory_space<vmem>>, vector<4x1xf32>
    %c0_11 = arith.constant 0 : index
    %c0_12 = arith.constant 0 : index
    %9 = vector.load %arg7[%c0_11, %c0_12] : memref<4x1xf32, #tpu.memory_space<vmem>>, vector<4x1xf32>
    %c17_i32 = arith.constant 17 : i32
    %10 = tpu.dynamic_rotate %6 by %c17_i32 dim 1 : vector<8x256xf32>, i32 -> vector<8x256xf32>
    %c0_13 = arith.constant 0 : index
    %c0_14 = arith.constant 0 : index
    %11 = vector.load %arg4[%c0_13, %c0_14] : memref<9x256xf32, #tpu.memory_space<vmem>>, vector<1x256xf32>
    %12 = vector.broadcast %11 : vector<1x256xf32> to vector<8x256xf32>
    %13 = arith.mulf %10, %12 : vector<8x256xf32>
    %c16_i32 = arith.constant 16 : i32
    %14 = tpu.dynamic_rotate %6 by %c16_i32 dim 1 : vector<8x256xf32>, i32 -> vector<8x256xf32>
    %c1 = arith.constant 1 : index
    %c0_15 = arith.constant 0 : index
    %15 = vector.load %arg4[%c1, %c0_15] : memref<9x256xf32, #tpu.memory_space<vmem>>, vector<1x256xf32>
    %16 = vector.broadcast %15 : vector<1x256xf32> to vector<8x256xf32>
    %17 = arith.mulf %14, %16 : vector<8x256xf32>
    %c15_i32 = arith.constant 15 : i32
    %18 = tpu.dynamic_rotate %6 by %c15_i32 dim 1 : vector<8x256xf32>, i32 -> vector<8x256xf32>
    %c2 = arith.constant 2 : index
    %c0_16 = arith.constant 0 : index
    %19 = vector.load %arg4[%c2, %c0_16] : memref<9x256xf32, #tpu.memory_space<vmem>>, vector<1x256xf32>
    %20 = vector.broadcast %19 : vector<1x256xf32> to vector<8x256xf32>
    %21 = arith.mulf %18, %20 : vector<8x256xf32>
    %c1_i32 = arith.constant 1 : i32
    %22 = tpu.dynamic_rotate %6 by %c1_i32 dim 1 : vector<8x256xf32>, i32 -> vector<8x256xf32>
    %c3 = arith.constant 3 : index
    %c0_17 = arith.constant 0 : index
    %23 = vector.load %arg4[%c3, %c0_17] : memref<9x256xf32, #tpu.memory_space<vmem>>, vector<1x256xf32>
    %24 = vector.broadcast %23 : vector<1x256xf32> to vector<8x256xf32>
    %25 = arith.mulf %22, %24 : vector<8x256xf32>
    %c255_i32 = arith.constant 255 : i32
    %26 = tpu.dynamic_rotate %6 by %c255_i32 dim 1 : vector<8x256xf32>, i32 -> vector<8x256xf32>
    %c5 = arith.constant 5 : index
    %c0_18 = arith.constant 0 : index
    %27 = vector.load %arg4[%c5, %c0_18] : memref<9x256xf32, #tpu.memory_space<vmem>>, vector<1x256xf32>
    %28 = vector.broadcast %27 : vector<1x256xf32> to vector<8x256xf32>
    %29 = arith.mulf %26, %28 : vector<8x256xf32>
    %c241_i32 = arith.constant 241 : i32
    %30 = tpu.dynamic_rotate %6 by %c241_i32 dim 1 : vector<8x256xf32>, i32 -> vector<8x256xf32>
    %c6 = arith.constant 6 : index
    %c0_19 = arith.constant 0 : index
    %31 = vector.load %arg4[%c6, %c0_19] : memref<9x256xf32, #tpu.memory_space<vmem>>, vector<1x256xf32>
    %32 = vector.broadcast %31 : vector<1x256xf32> to vector<8x256xf32>
    %33 = arith.mulf %30, %32 : vector<8x256xf32>
    %c240_i32 = arith.constant 240 : i32
    %34 = tpu.dynamic_rotate %6 by %c240_i32 dim 1 : vector<8x256xf32>, i32 -> vector<8x256xf32>
    %c7 = arith.constant 7 : index
    %c0_20 = arith.constant 0 : index
    %35 = vector.load %arg4[%c7, %c0_20] : memref<9x256xf32, #tpu.memory_space<vmem>>, vector<1x256xf32>
    %36 = vector.broadcast %35 : vector<1x256xf32> to vector<8x256xf32>
    %37 = arith.mulf %34, %36 : vector<8x256xf32>
    %c239_i32 = arith.constant 239 : i32
    %38 = tpu.dynamic_rotate %6 by %c239_i32 dim 1 : vector<8x256xf32>, i32 -> vector<8x256xf32>
    %c8 = arith.constant 8 : index
    %c0_21 = arith.constant 0 : index
    %39 = vector.load %arg4[%c8, %c0_21] : memref<9x256xf32, #tpu.memory_space<vmem>>, vector<1x256xf32>
    %40 = vector.broadcast %39 : vector<1x256xf32> to vector<8x256xf32>
    %41 = arith.mulf %38, %40 : vector<8x256xf32>
    %42 = tpu.concatenate %13, %17, %21, %25, %6, %29, %33, %37, %41 in 0 : vector<8x256xf32>, vector<8x256xf32>, vector<8x256xf32>, vector<8x256xf32>, vector<8x256xf32>, vector<8x256xf32>, vector<8x256xf32>, vector<8x256xf32>, vector<8x256xf32> -> vector<72x256xf32>
    %cst_22 = arith.constant dense<0.000000e+00> : vector<4x256xf32>
    %43 = tpu.matmul %7, %42, %cst_22 {dimension_numbers = #tpu.dot_dimension_numbers<[1], [0], [0], [1], [0, 0, 1, 1], [], []>} : vector<4x72xf32>, vector<72x256xf32>, vector<4x256xf32> -> vector<4x256xf32>
    %44 = vector.broadcast %8 : vector<4x1xf32> to vector<4x256xf32>
    %45 = arith.mulf %43, %44 : vector<4x256xf32>
    %46 = vector.broadcast %9 : vector<4x1xf32> to vector<4x256xf32>
    %47 = arith.addf %45, %46 : vector<4x256xf32>
    %cst_23 = arith.constant 0.000000e+00 : f32
    %48 = vector.broadcast %cst_23 : f32 to vector<4x256xf32>
    %49 = arith.maximumf %47, %48 : vector<4x256xf32>
    %c0_24 = arith.constant 0 : index
    %c0_25 = arith.constant 0 : index
    %50 = vector.load %arg8[%c0_24, %c0_25] : memref<4x36xf32, #tpu.memory_space<vmem>>, vector<4x36xf32>
    %c0_26 = arith.constant 0 : index
    %c0_27 = arith.constant 0 : index
    %51 = vector.load %arg9[%c0_26, %c0_27] : memref<4x1xf32, #tpu.memory_space<vmem>>, vector<4x1xf32>
    %c0_28 = arith.constant 0 : index
    %c0_29 = arith.constant 0 : index
    %52 = vector.load %arg10[%c0_28, %c0_29] : memref<4x1xf32, #tpu.memory_space<vmem>>, vector<4x1xf32>
    %c17_i32_30 = arith.constant 17 : i32
    %53 = tpu.dynamic_rotate %49 by %c17_i32_30 dim 1 : vector<4x256xf32>, i32 -> vector<4x256xf32>
    %c0_31 = arith.constant 0 : index
    %c0_32 = arith.constant 0 : index
    %54 = vector.load %arg4[%c0_31, %c0_32] : memref<9x256xf32, #tpu.memory_space<vmem>>, vector<1x256xf32>
    %55 = vector.broadcast %54 : vector<1x256xf32> to vector<4x256xf32>
    %56 = arith.mulf %53, %55 : vector<4x256xf32>
    %c16_i32_33 = arith.constant 16 : i32
    %57 = tpu.dynamic_rotate %49 by %c16_i32_33 dim 1 : vector<4x256xf32>, i32 -> vector<4x256xf32>
    %c1_34 = arith.constant 1 : index
    %c0_35 = arith.constant 0 : index
    %58 = vector.load %arg4[%c1_34, %c0_35] : memref<9x256xf32, #tpu.memory_space<vmem>>, vector<1x256xf32>
    %59 = vector.broadcast %58 : vector<1x256xf32> to vector<4x256xf32>
    %60 = arith.mulf %57, %59 : vector<4x256xf32>
    %c15_i32_36 = arith.constant 15 : i32
    %61 = tpu.dynamic_rotate %49 by %c15_i32_36 dim 1 : vector<4x256xf32>, i32 -> vector<4x256xf32>
    %c2_37 = arith.constant 2 : index
    %c0_38 = arith.constant 0 : index
    %62 = vector.load %arg4[%c2_37, %c0_38] : memref<9x256xf32, #tpu.memory_space<vmem>>, vector<1x256xf32>
    %63 = vector.broadcast %62 : vector<1x256xf32> to vector<4x256xf32>
    %64 = arith.mulf %61, %63 : vector<4x256xf32>
    %c1_i32_39 = arith.constant 1 : i32
    %65 = tpu.dynamic_rotate %49 by %c1_i32_39 dim 1 : vector<4x256xf32>, i32 -> vector<4x256xf32>
    %c3_40 = arith.constant 3 : index
    %c0_41 = arith.constant 0 : index
    %66 = vector.load %arg4[%c3_40, %c0_41] : memref<9x256xf32, #tpu.memory_space<vmem>>, vector<1x256xf32>
    %67 = vector.broadcast %66 : vector<1x256xf32> to vector<4x256xf32>
    %68 = arith.mulf %65, %67 : vector<4x256xf32>
    %c255_i32_42 = arith.constant 255 : i32
    %69 = tpu.dynamic_rotate %49 by %c255_i32_42 dim 1 : vector<4x256xf32>, i32 -> vector<4x256xf32>
    %c5_43 = arith.constant 5 : index
    %c0_44 = arith.constant 0 : index
    %70 = vector.load %arg4[%c5_43, %c0_44] : memref<9x256xf32, #tpu.memory_space<vmem>>, vector<1x256xf32>
    %71 = vector.broadcast %70 : vector<1x256xf32> to vector<4x256xf32>
    %72 = arith.mulf %69, %71 : vector<4x256xf32>
    %c241_i32_45 = arith.constant 241 : i32
    %73 = tpu.dynamic_rotate %49 by %c241_i32_45 dim 1 : vector<4x256xf32>, i32 -> vector<4x256xf32>
    %c6_46 = arith.constant 6 : index
    %c0_47 = arith.constant 0 : index
    %74 = vector.load %arg4[%c6_46, %c0_47] : memref<9x256xf32, #tpu.memory_space<vmem>>, vector<1x256xf32>
    %75 = vector.broadcast %74 : vector<1x256xf32> to vector<4x256xf32>
    %76 = arith.mulf %73, %75 : vector<4x256xf32>
    %c240_i32_48 = arith.constant 240 : i32
    %77 = tpu.dynamic_rotate %49 by %c240_i32_48 dim 1 : vector<4x256xf32>, i32 -> vector<4x256xf32>
    %c7_49 = arith.constant 7 : index
    %c0_50 = arith.constant 0 : index
    %78 = vector.load %arg4[%c7_49, %c0_50] : memref<9x256xf32, #tpu.memory_space<vmem>>, vector<1x256xf32>
    %79 = vector.broadcast %78 : vector<1x256xf32> to vector<4x256xf32>
    %80 = arith.mulf %77, %79 : vector<4x256xf32>
    %c239_i32_51 = arith.constant 239 : i32
    %81 = tpu.dynamic_rotate %49 by %c239_i32_51 dim 1 : vector<4x256xf32>, i32 -> vector<4x256xf32>
    %c8_52 = arith.constant 8 : index
    %c0_53 = arith.constant 0 : index
    %82 = vector.load %arg4[%c8_52, %c0_53] : memref<9x256xf32, #tpu.memory_space<vmem>>, vector<1x256xf32>
    %83 = vector.broadcast %82 : vector<1x256xf32> to vector<4x256xf32>
    %84 = arith.mulf %81, %83 : vector<4x256xf32>
    %85 = tpu.concatenate %56, %60, %64, %68, %49, %72, %76, %80, %84 in 0 : vector<4x256xf32>, vector<4x256xf32>, vector<4x256xf32>, vector<4x256xf32>, vector<4x256xf32>, vector<4x256xf32>, vector<4x256xf32>, vector<4x256xf32>, vector<4x256xf32> -> vector<36x256xf32>
    %cst_54 = arith.constant dense<0.000000e+00> : vector<4x256xf32>
    %86 = tpu.matmul %50, %85, %cst_54 {dimension_numbers = #tpu.dot_dimension_numbers<[1], [0], [0], [1], [0, 0, 1, 1], [], []>} : vector<4x36xf32>, vector<36x256xf32>, vector<4x256xf32> -> vector<4x256xf32>
    %87 = vector.broadcast %51 : vector<4x1xf32> to vector<4x256xf32>
    %88 = arith.mulf %86, %87 : vector<4x256xf32>
    %89 = vector.broadcast %52 : vector<4x1xf32> to vector<4x256xf32>
    %90 = arith.addf %88, %89 : vector<4x256xf32>
    %cst_55 = arith.constant 0.000000e+00 : f32
    %91 = vector.broadcast %cst_55 : f32 to vector<4x256xf32>
    %92 = arith.maximumf %90, %91 : vector<4x256xf32>
    %c0_56 = arith.constant 0 : index
    %c0_57 = arith.constant 0 : index
    %c0_58 = arith.constant 0 : index
    %93 = vector.load %arg11[%c0_56, %c0_57, %c0_58] : memref<1x4x256xf32, #tpu.memory_space<vmem>>, vector<1x4x256xf32>
    %94 = vector.shape_cast %93 : vector<1x4x256xf32> to vector<4x256xf32>
    %95 = vector.shape_cast %92 : vector<4x256xf32> to vector<1x4x256xf32>
    tpu.vector_store %arg11[%c0_56, %c0_57, %c0_58], %95 {strides = array<i32>} : memref<1x4x256xf32, #tpu.memory_space<vmem>>, vector<1x4x256xf32>,
    return
  }
  func.func @transform_0(%arg0: i32) -> (i32, i32, i32) {
    %c0_i32 = arith.constant 0 : i32
    %c0_i32_0 = arith.constant 0 : i32
    %c0_i32_1 = arith.constant 0 : i32
    return %arg0, %c0_i32, %c0_i32_0 : i32, i32, i32
  }
  func.func @transform_1(%arg0: i32) -> (i32, i32, i32) {
    %c0_i32 = arith.constant 0 : i32
    %c0_i32_0 = arith.constant 0 : i32
    %c0_i32_1 = arith.constant 0 : i32
    return %arg0, %c0_i32, %c0_i32_0 : i32, i32, i32
  }
  func.func @transform_2(%arg0: i32) -> (i32, i32) {
    %c0_i32 = arith.constant 0 : i32
    %c0_i32_0 = arith.constant 0 : i32
    %c0_i32_1 = arith.constant 0 : i32
    return %c0_i32, %c0_i32_0 : i32, i32
  }
  func.func @transform_3(%arg0: i32) -> (i32, i32) {
    %c0_i32 = arith.constant 0 : i32
    %c0_i32_0 = arith.constant 0 : i32
    %c0_i32_1 = arith.constant 0 : i32
    return %c0_i32, %c0_i32_0 : i32, i32
  }
  func.func @transform_4(%arg0: i32) -> (i32, i32) {
    %c0_i32 = arith.constant 0 : i32
    %c0_i32_0 = arith.constant 0 : i32
    %c0_i32_1 = arith.constant 0 : i32
    return %c0_i32, %c0_i32_0 : i32, i32
  }
  func.func @transform_5(%arg0: i32) -> (i32, i32) {
    %c0_i32 = arith.constant 0 : i32
    %c0_i32_0 = arith.constant 0 : i32
    %c0_i32_1 = arith.constant 0 : i32
    return %c0_i32, %c0_i32_0 : i32, i32
  }
  func.func @transform_6(%arg0: i32) -> (i32, i32) {
    %c0_i32 = arith.constant 0 : i32
    %c0_i32_0 = arith.constant 0 : i32
    %c0_i32_1 = arith.constant 0 : i32
    return %c0_i32, %c0_i32_0 : i32, i32
  }
  func.func @transform_7(%arg0: i32) -> (i32, i32) {
    %c0_i32 = arith.constant 0 : i32
    %c0_i32_0 = arith.constant 0 : i32
    %c0_i32_1 = arith.constant 0 : i32
    return %c0_i32, %c0_i32_0 : i32, i32
  }
  func.func @transform_8(%arg0: i32) -> (i32, i32) {
    %c0_i32 = arith.constant 0 : i32
    %c0_i32_0 = arith.constant 0 : i32
    %c0_i32_1 = arith.constant 0 : i32
    return %c0_i32, %c0_i32_0 : i32, i32
  }
  func.func @transform_9(%arg0: i32) -> (i32, i32) {
    %c0_i32 = arith.constant 0 : i32
    %c0_i32_0 = arith.constant 0 : i32
    %c0_i32_1 = arith.constant 0 : i32
    return %c0_i32, %c0_i32_0 : i32, i32
  }
  func.func @transform_10(%arg0: i32) -> (i32, i32, i32) {
    %c0_i32 = arith.constant 0 : i32
    %c0_i32_0 = arith.constant 0 : i32
    %c0_i32_1 = arith.constant 0 : i32
    return %arg0, %c0_i32, %c0_i32_0 : i32, i32, i32
  }
}

</mosaic_0001>

<bundles_post_ra>
// kernel: up_forward.1
= control target key start
LH: loop header
LB: loop body
LE: loop exit
PB: predicated region body
PF: predicated region fallthrough
CT: control target
= control target key end

     0   :  { %s1181_s13 = smov 0   ;;  %s1549_s0 = inlined_call_operand.vmem [shape: f32[2,4,64], index: 0, kind: input, shape index: {}]   ;;  %s1550_s1 = inlined_call_operand.vmem [shape: f32[2,4,256], index: 1, kind: input, shape index: {}]   ;;  %s1551_s2 = inlined_call_operand.vmem [shape: f32[64,256], index: 2, kind: input, shape index: {}]   ;;  %s1552_s3 = inlined_call_operand.vmem [shape: f32[9,256], index: 3, kind: input, shape index: {}]   ;;  %s1553_s4 = inlined_call_operand.vmem [shape: f32[4,72], index: 4, kind: input, shape index: {}]   ;;  %s1554_s5 = inlined_call_operand.vmem [shape: f32[4,1], index: 5, kind: input, shape index: {}]   ;;  %s1555_s6 = inlined_call_operand.vmem [shape: f32[4,1], index: 6, kind: input, shape index: {}]   ;;  %s1556_s7 = inlined_call_operand.vmem [shape: f32[4,36], index: 7, kind: input, shape index: {}]   ;;  %s1557_s8 = inlined_call_operand.vmem [shape: f32[4,1], index: 8, kind: input, shape index: {}]   ;;  %s1558_s9 = inlined_call_operand.vmem [shape: f32[4,1], index: 9, kind: input, shape index: {}]   ;;  %s1559_s10 = inlined_call_operand.vmem [shape: f32[2,4,256], index: 10, kind: output, shape index: {}]  }
   0x1 LB: > { %s1021_s14 = sadd.s32 4294967295, %s1114_s13   ;;  %p1025_p0 = scmp.ge.s32.totalorder %s1114_s13, 1  ;;  %s1114_s13 = sphi %s1181_s13, %s20_s13  }
   0x2   : > { %p321_p1 = scmp.lt.s32.totalorder %s1114_s13, 3 }
   0x4   : > { %p322_p2 = pnand %p1025_p0, %p321_p1 }
   0x5   : > { %v379_v0 = vld [vmem:[%s1551_s2 + $0x8] sm:$0xff] (!%p322_p2)  ;;  %v381_v1 = vld [vmem:[%s1551_s2 + $0x18] sm:$0xff] (!%p322_p2)  ;;  %v378_v2 = vld [vmem:[%s1551_s2] sm:$0xff] (!%p322_p2)  ;;  %v1116_v7 = vmov (!%p322_p2), 0.0   ;;  %p363_p3 = scmp.lt.s32.totalorder (!%p322_p2), %s1021_s14, 1  ;;  %vm394_vm0 = vcmask (!%p322_p2), 523264   ;;  %v489_v37 = vlaneseq (!%p322_p2) }
   0x6   : > { %325 = sbr.rel (%p322_p2) target bundleno = 981 (0x3d5), region = 60  ;;  %v1047_v3 = vpack.c.bf16 (!%p322_p2), %v381_v1, %v379_v0  ;;  %v380_v4 = vld [vmem:[%s1551_s2 + $0x10] sm:$0xff] (!%p322_p2)  ;;  %v383_v5 = vld [vmem:[%s1551_s2 + $0x28] sm:$0xff] (!%p322_p2)  ;;  %v385_v6 = vld [vmem:[%s1551_s2 + $0x38] sm:$0xff] (!%p322_p2)  ;;  %462 = vmatprep.mubr.f32.mxu0 (!%p322_p2), %v1116_v7  ;;  %730 = vmatprep.mubr.f32.mxu1 (!%p322_p2), %v1116_v7  ;;  %vm479_vm1 = vcmask (!%p322_p2), 1043456   ;;  %s1117_s19 = smov (!%p322_p2), 16  }
   0x7   : > { %v1049_v8 = vpack.c.bf16 (!%p322_p2), %v380_v4, %v378_v2  ;;  %v1051_v9 = vpack.c.bf16 (!%p322_p2), %v385_v6, %v383_v5  ;;  %v382_v10 = vld [vmem:[%s1551_s2 + $0x20] sm:$0xff] (!%p322_p2)  ;;  %v384_v11 = vld [vmem:[%s1551_s2 + $0x30] sm:$0xff] (!%p322_p2)  ;;  %v387_v12 = vld [vmem:[%s1551_s2 + $0x48] sm:$0xff] (!%p322_p2)  ;;  %s1118_s20 = smov (!%p322_p2), 17   ;;  %s1119_s21 = smov (!%p322_p2), 15   ;;  %v1123_v34 = vmov (!%p322_p2), 0  }
   0x8   : > { %1048 = vmatprep.subr.bf16.mxu0 (!%p322_p2), %v1047_v3  ;;  %v389_v13 = vld [vmem:[%s1551_s2 + $0x58] sm:$0xff] (!%p322_p2)  ;;  %v1053_v14 = vpack.c.bf16 (!%p322_p2), %v384_v11, %v382_v10  ;;  %v386_v16 = vld [vmem:[%s1551_s2 + $0x40] sm:$0xff] (!%p322_p2)  ;;  %v388_v17 = vld [vmem:[%s1551_s2 + $0x50] sm:$0xff] (!%p322_p2)  ;;  %s1120_s22 = smov (!%p322_p2), 1   ;;  %s1121_s23 = smov (!%p322_p2), 127   ;;  %1105 = vset.pattern.permute.xlu0 (!%p322_p2), %v1123_v34  ;;  %v497_v40 = vshrl.u32 (!%p322_p2), %v489_v37, 7 }
   0x9   : > { %1050 = vmatpush1.bf16.msra.mxu0 (!%p322_p2), %v1049_v8  ;;  %v1055_v15 = vpack.c.bf16 (!%p322_p2), %v389_v13, %v387_v12  ;;  %v391_v18 = vld [vmem:[%s1551_s2 + $0x68] sm:$0xff] (!%p322_p2)  ;;  %v393_v19 = vld [vmem:[%s1551_s2 + $0x78] sm:$0xff] (!%p322_p2)  ;;  %v1057_v20 = vpack.c.bf16 (!%p322_p2), %v388_v17, %v386_v16  ;;  %v390_v22 = vld [vmem:[%s1551_s2 + $0x60] sm:$0xff] (!%p322_p2)  ;;  %s1122_s24 = smov (!%p322_p2), 113   ;;  %1106 = vset.pattern.permute.xlu1 (!%p322_p2), %v1123_v34  ;;  %s1124_s25 = smov (!%p322_p2), 112   ;;  %v1297_v41 = vand.u32 (!%p322_p2), 127, %v489_v37 }
   0xa   : > { %1052 = vmatprep.subr.bf16.mxu0 (!%p322_p2), %v1051_v9  ;;  %v1059_v21 = vpack.c.bf16 (!%p322_p2), %v393_v19, %v391_v18  ;;  %v392_v23 = vld [vmem:[%s1551_s2 + $0x70] sm:$0xff] (!%p322_p2)  ;;  %s1125_s26 = smov (!%p322_p2), 111   ;;  %v483_v35 = vld [vmem:[%s1554_s5] sm:$0xf] (!%p322_p2)  ;;  %v1299_v43 = vsub.s32 (!%p322_p2), 0, %v497_v40  ;;  %v1301_v45 = vsub.s32 (!%p322_p2), 1, %v497_v40 }
   0xb   : > { %v1061_v24 = vpack.c.bf16 (!%p322_p2), %v392_v23, %v390_v22  ;;  %v484_v36 = vld [vmem:[%s1555_s6] sm:$0xf] (!%p322_p2)  ;;  %vm512_vm2 = vcmp.lt.s32.totalorder (!%p322_p2), %v1297_v41, 16  ;;  %vm534_vm3 = vcmp.lt.s32.totalorder (!%p322_p2), %v1297_v41, 15  ;;  %vm556_vm4 = vcmp.lt.s32.totalorder (!%p322_p2), %v1297_v41, 1 }
   0xc   : > { %v1032_v46 = vld [vmem:[%s1552_s3 + $0x1] ss:$8 sm:$0x3] (!%p322_p2)  ;;  %v1034_v47 = vld [vmem:[%s1552_s3 + $0x3] ss:$8 sm:$0x3] (!%p322_p2) }
   0xd   : > { %s1561_s14 = smov (!%p363_p3, %s1021_s14), 1  ;;  %1054 = vmatpush1.bf16.msra.mxu0 %v1053_v14  ;;  %v494_v48 = vld [vmem:[%s1552_s3] ss:$8 sm:$0x3]  ;;  %v1314_v49 = vrot.slane %v1032_v46, %v1299_v43  ;;  %v1320_v53 = vrot.slane %v1032_v46, %v1301_v45  ;;  %v1332_v57 = vrot.slane %v1034_v47, %v1301_v45  ;;  %vm491_vm5 = vcmp.lt.s32.totalorder %v1297_v41, 17 }
   0xe   : > { %1056 = vmatprep.subr.bf16.mxu0 %v1055_v15  ;;  %s1026_s29 = sshll.u32 %s1561_s14, 2  ;;  %s1045_s15 = sshll.u32 %s1561_s14, 3  ;;  %v1033_v51 = vld [vmem:[%s1552_s3 + $0x2] ss:$8 sm:$0x3]  ;;  %v1336_v58 = vrot.slane %v494_v48, %v1299_v43  ;;  %v1339_v59 = vrot.slane %v494_v48, %v1301_v45  ;;  %v1345_v61 = vrot.slane %v1034_v47, %v1299_v43  ;;  %vm578_vm6 = vcmp.lt.s32.totalorder %v1297_v41, 127 }
   0xf   : > { %s366_s12 = scalar_lea.vmem %s1549_s0, %s1026_s29  ;;  %s371_s18 = scalar_lea.vmem %s1550_s1, %s1045_s15  ;;  %v1035_v56 = vld [vmem:[%s1552_s3 + $0x5] ss:$8 sm:$0x3]  ;;  %v1342_v60 = vrot.slane %v1033_v51, %v1301_v45  ;;  %v1367_v11 = vrot.slane %v1033_v51, %v1299_v43  ;;  %vm600_vm7 = vcmp.lt.s32.totalorder %v1297_v41, 113  ;;  %vm622_vm8 = vcmp.lt.s32.totalorder %v1297_v41, 112 }
  0x10   : > { %v377_v25 = vld [vmem:[%s366_s12] sm:$0xf]  ;;  %v1350_v1 = vrot.slane %v1035_v56, %v1301_v45  ;;  %v1374_v19 = vrot.slane %v1035_v56, %v1299_v43  ;;  %vm644_vm9 = vcmp.lt.s32.totalorder %v1297_v41, 111  ;;  %vm662_vm10 = vcmask 588800   ;;  %s376_s11 = scalar_lea.vmem %s1559_s10, %s1045_s15 }
  0x11   : > { %1058 = vmatpush1.bf16.msra.mxu0 %v1057_v20  ;;  %v469_v27 = vld [vmem:[%s371_s18] sm:$0xff]  ;;  %vm852_vm11 = vcmask 293888  }
  0x12   : > { %1060 = vmatprep.subr.bf16.mxu0 %v1059_v21  ;;  %v471_v30 = vcombine.high %v469_v27, %v469_v27 }
  0x15   : > { %1062 = vmatpush1.bf16.msra.mxu0 %v1061_v24  ;;  %v1036_v24 = vld [vmem:[%s1552_s3 + $0x6] ss:$8 sm:$0x3] }
  0x18   : > { %1031 = vmatmul.mubr.msk.f32.vlgmr.msra.gmra.mrb[0].mxu0 %vm394_vm0, %v377_v25 }
  0x19   : > { %926 = vmatprep.mubr.f32.mxu0 %v1116_v7 }
  0xeb   : > { %v464_v26 = vpop.f32.mrb[0].mxu0 }
  0xec   : > { %v475_v28 = vrot.slane %v464_v26, 4  ;;  %v466_v29 = vpop.f32.mrb[1].mxu0  ;;  %v1037_v26 = vld [vmem:[%s1552_s3 + $0x7] ss:$8 sm:$0x3] }
  0xed   : > { %v476_v32 = vrot.slane %v466_v29, 4  ;;  %v1402_v37 = vrot.slane %v1037_v26, %v1301_v45 }
  0xee   : > { %v1254_v31 = vsel %vm479_vm1, %v469_v27, %v475_v28 }
  0xef   : > { %508 = vrot.lane.b32.xlu1 %v1254_v31, %s1117_s19  ;;  %485 = vrot.lane.b32.xlu0 %v1254_v31, %s1118_s20  ;;  %v1261_v33 = vsel %vm479_vm1, %v471_v30, %v476_v32  ;;  %v1391_v30 = vrot.slane %v1036_v24, %v1299_v43  ;;  %v1394_v32 = vrot.slane %v1036_v24, %v1301_v45 }
  0xf3   : > { %530 = vrot.lane.b32.xlu0 %v1254_v31, %s1119_s21  ;;  %510 = vrot.lane.b32.xlu1 %v1261_v33, %s1117_s19 }
  0xf7   : > { %552 = vrot.lane.b32.xlu0 %v1254_v31, %s1120_s22  ;;  %532 = vrot.lane.b32.xlu1 %v1261_v33, %s1119_s21 }
  0xfb   : > { %554 = vrot.lane.b32.xlu1 %v1261_v33, %s1120_s22  ;;  %487 = vrot.lane.b32.xlu0 %v1261_v33, %s1118_s20 }
  0xff   : > { %576 = vrot.lane.b32.xlu1 %v1261_v33, %s1121_s23  ;;  %574 = vrot.lane.b32.xlu0 %v1254_v31, %s1121_s23 }
 0x103   : > { %598 = vrot.lane.b32.xlu1 %v1261_v33, %s1122_s24  ;;  %596 = vrot.lane.b32.xlu0 %v1254_v31, %s1122_s24 }
 0x107   : > { %620 = vrot.lane.b32.xlu1 %v1261_v33, %s1124_s25  ;;  %618 = vrot.lane.b32.xlu0 %v1254_v31, %s1124_s25 }
 0x10b   : > { %642 = vrot.lane.b32.xlu1 %v1261_v33, %s1125_s26  ;;  %640 = vrot.lane.b32.xlu0 %v1254_v31, %s1125_s26 }
 0x10f   : > { %739 = vperm.xlu0 %1105, %v483_v35   ;;  %746 = vperm.xlu1 %1106, %v484_v36   ;;  %v1399_v36 = vrot.slane %v1037_v26, %v1299_v43 }
 0x161   : > { %v509_v38 = vpop.permute.xlu1 %508  ;;  %v486_v39 = vpop.permute.xlu0 %485 }
 0x165   : > { %v531_v42 = vpop.permute.xlu0 %530  ;;  %v511_v44 = vpop.permute.xlu1 %510 }
 0x166   : > { %v513_v54 = vsel %vm512_vm2, %v509_v38, %v511_v44  ;;  %v514_v55 = vsel %vm512_vm2, %v511_v44, %v509_v38  ;;  %v1038_v38 = vld [vmem:[%s1552_s3 + $0x10] ss:$8 sm:$0x3] }
 0x167   : > { %v528_v62 = vmul.f32 %v1314_v49, %v514_v55  ;;  %v529_v2 = vmul.f32 %v1320_v53, %v513_v54  ;;  %v1418_v48 = vrot.slane %v1038_v38, %v1301_v45 }
 0x169   : > { %v553_v50 = vpop.permute.xlu0 %552  ;;  %v533_v52 = vpop.permute.xlu1 %532 }
 0x16a   : > { %v535_v3 = vsel %vm534_vm3, %v531_v42, %v533_v52  ;;  %v536_v12 = vsel %vm534_vm3, %v533_v52, %v531_v42 }
 0x16b   : > { %v551_v13 = vmul.f32 %v1342_v60, %v535_v3  ;;  %v550_v25 = vmul.f32 %v1367_v11, %v536_v12 }
 0x16d   : > { %v555_v63 = vpop.permute.xlu1 %554  ;;  %v488_v0 = vpop.permute.xlu0 %487 }
 0x16e   : > { %v557_v4 = vsel %vm556_vm4, %v553_v50, %v555_v63  ;;  %v492_v5 = vsel %vm491_vm5, %v486_v39, %v488_v0  ;;  %v493_v6 = vsel %vm491_vm5, %v488_v0, %v486_v39  ;;  %v558_v7 = vsel %vm556_vm4, %v555_v63, %v553_v50 }
 0x16f   : > { %v573_v8 = vmul.f32 %v1332_v57, %v557_v4  ;;  %v506_v9 = vmul.f32 %v1336_v58, %v493_v6  ;;  %v507_v10 = vmul.f32 %v1339_v59, %v492_v5  ;;  %v572_v18 = vmul.f32 %v1345_v61, %v558_v7  ;;  %v482_v4 = vld [vmem:[%s1553_s4] sm:$0xf] }
 0x170   : > { %v1425_v0 = vrot.slane %v1038_v38, %v1299_v43 }
 0x171   : > { %v577_v14 = vpop.permute.xlu1 %576  ;;  %v575_v15 = vpop.permute.xlu0 %574  ;;  %v1063_v16 = vpack.c.bf16 %v529_v2, %v507_v10  ;;  %v1065_v17 = vpack.c.bf16 %v528_v62, %v506_v9  ;;  %v1067_v23 = vpack.c.bf16 %v573_v8, %v551_v13  ;;  %v1069_v34 = vpack.c.bf16 %v572_v18, %v550_v25 }
 0x172   : > { %v580_v20 = vsel %vm578_vm6, %v577_v14, %v575_v15  ;;  %v579_v21 = vsel %vm578_vm6, %v575_v15, %v577_v14  ;;  %v754_v15 = vld [vmem:[%s1557_s8] sm:$0xf] }
 0x173   : > { %v595_v22 = vmul.f32 %v1350_v1, %v580_v20  ;;  %1064 = vmatprep.subr.bf16.mxu1 %v1063_v16  ;;  %v594_v29 = vmul.f32 %v1374_v19, %v579_v21  ;;  %v755_v16 = vld [vmem:[%s1558_s9] sm:$0xf] }
 0x174   : > { %1066 = vmatpush1.bf16.msra.mxu1 %v1065_v17 }
 0x175   : > { %v599_v27 = vpop.permute.xlu1 %598  ;;  %1068 = vmatprep.subr.bf16.mxu1 %v1067_v23  ;;  %v597_v28 = vpop.permute.xlu0 %596  ;;  %v1071_v35 = vpack.c.bf16 %v595_v22, %v1261_v33  ;;  %v1073_v47 = vpack.c.bf16 %v594_v29, %v1254_v31 }
 0x176   : > { %v601_v39 = vsel %vm600_vm7, %v597_v28, %v599_v27  ;;  %v602_v40 = vsel %vm600_vm7, %v599_v27, %v597_v28 }
 0x177   : > { %v616_v50 = vmul.f32 %v1391_v30, %v601_v39  ;;  %v617_v51 = vmul.f32 %v1394_v32, %v602_v40 }
 0x178   : > { %1070 = vmatpush1.bf16.msra.mxu1 %v1069_v34 }
 0x179   : > { %v621_v33 = vpop.permute.xlu1 %620  ;;  %1072 = vmatprep.subr.bf16.mxu1 %v1071_v35  ;;  %v619_v42 = vpop.permute.xlu0 %618 }
 0x17a   : > { %v623_v44 = vsel %vm622_vm8, %v619_v42, %v621_v33  ;;  %v624_v46 = vsel %vm622_vm8, %v621_v33, %v619_v42 }
 0x17b   : > { %v638_v52 = vmul.f32 %v1399_v36, %v623_v44  ;;  %v639_v54 = vmul.f32 %v1402_v37, %v624_v46 }
 0x17c   : > { %1074 = vmatpush1.bf16.msra.mxu1 %v1073_v47 }
 0x17d   : > { %v643_v55 = vpop.permute.xlu1 %642  ;;  %v641_v56 = vpop.permute.xlu0 %640  ;;  %v1075_v62 = vpack.c.bf16 %v639_v54, %v617_v51  ;;  %v1077_v63 = vpack.c.bf16 %v638_v52, %v616_v50 }
 0x17e   : > { %v646_v31 = vsel %vm644_vm9, %v643_v55, %v641_v56  ;;  %v645_v45 = vsel %vm644_vm9, %v641_v56, %v643_v55 }
 0x17f   : > { %v661_v2 = vmul.f32 %v1418_v48, %v646_v31  ;;  %1076 = vmatprep.subr.bf16.mxu1 %v1075_v62  ;;  %v660_v3 = vmul.f32 %v1425_v0, %v645_v45 }
 0x180   : > { %1078 = vmatpush1.bf16.msra.mxu1 %v1077_v63 }
 0x181   : > { %682 = vmatprep.subr.mxu1 %v661_v2 }
 0x184   : > { %683 = vmatpush1.msra.mxu1 %v660_v3 }
 0x185   : > { %1039 = vmatmul.mubr.msk.f32.vlgmr.msra.gmra.mrb[0].mxu1 %vm662_vm10, %v482_v4 }
 0x18e   : > { %v740_v43 = vpop.permute.xlu0 %739  ;;  %v747_v6 = vpop.permute.xlu1 %746 }
 0x258   : > { %v732_v5 = vpop.f32.mrb[0].mxu1 }
 0x259   : > { %v742_v7 = vmul.f32 %v740_v43, %v732_v5  ;;  %v734_v8 = vpop.f32.mrb[1].mxu1 }
 0x25a   : > { %v743_v9 = vmul.f32 %v740_v43, %v734_v8 }
 0x25b   : > { %v749_v10 = vadd.f32 %v747_v6, %v742_v7 }
 0x25c   : > { %v750_v12 = vadd.f32 %v747_v6, %v743_v9 }
 0x25d   : > { %v1436_v13 = vmax.f32 %v749_v10, 0.0 }
 0x25e   : > { %v1438_v14 = vmax.f32 %v750_v12, 0.0 }
 0x25f   : > { %764 = vrot.lane.b32.xlu1 %v1436_v13, %s1117_s19 }
 0x260   : > { %766 = vrot.lane.b32.xlu0 %v1438_v14, %s1117_s19 }
 0x263   : > { %780 = vrot.lane.b32.xlu1 %v1436_v13, %s1120_s22 }
 0x264   : > { %782 = vrot.lane.b32.xlu0 %v1438_v14, %s1120_s22 }
 0x267   : > { %756 = vrot.lane.b32.xlu1 %v1436_v13, %s1118_s20 }
 0x268   : > { %758 = vrot.lane.b32.xlu0 %v1438_v14, %s1118_s20 }
 0x26b   : > { %772 = vrot.lane.b32.xlu1 %v1436_v13, %s1119_s21 }
 0x26c   : > { %774 = vrot.lane.b32.xlu0 %v1438_v14, %s1119_s21 }
 0x26f   : > { %788 = vrot.lane.b32.xlu1 %v1436_v13, %s1121_s23 }
 0x270   : > { %790 = vrot.lane.b32.xlu0 %v1438_v14, %s1121_s23 }
 0x273   : > { %804 = vrot.lane.b32.xlu1 %v1436_v13, %s1124_s25 }
 0x274   : > { %806 = vrot.lane.b32.xlu0 %v1438_v14, %s1124_s25 }
 0x277   : > { %796 = vrot.lane.b32.xlu1 %v1436_v13, %s1122_s24 }
 0x278   : > { %798 = vrot.lane.b32.xlu0 %v1438_v14, %s1122_s24 }
 0x27b   : > { %812 = vrot.lane.b32.xlu1 %v1436_v13, %s1125_s26 }
 0x27c   : > { %814 = vrot.lane.b32.xlu0 %v1438_v14, %s1125_s26 }
 0x27f   : > { %935 = vperm.xlu1 %1106, %v754_v15  }
 0x280   : > { %942 = vperm.xlu0 %1105, %v755_v16  }
 0x2d1   : > { %v765_v17 = vpop.permute.xlu1 %764 }
 0x2d2   : > { %v767_v18 = vpop.permute.xlu0 %766 }
 0x2d3   : > { %v768_v22 = vsel %vm512_vm2, %v765_v17, %v767_v18  ;;  %v769_v23 = vsel %vm512_vm2, %v767_v18, %v765_v17 }
 0x2d4   : > { %v770_v28 = vmul.f32 %v769_v23, %v1314_v49  ;;  %v771_v29 = vmul.f32 %v768_v22, %v1320_v53 }
 0x2d5   : > { %v781_v20 = vpop.permute.xlu1 %780 }
 0x2d6   : > { %v783_v21 = vpop.permute.xlu0 %782  ;;  %v822_v46 = vrot.slane %v770_v28, 4  ;;  %v823_v49 = vrot.slane %v771_v29, 4 }
 0x2d7   : > { %v784_v24 = vsel %vm556_vm4, %v781_v20, %v783_v21  ;;  %v785_v25 = vsel %vm556_vm4, %v783_v21, %v781_v20 }
 0x2d8   : > { %v786_v38 = vmul.f32 %v785_v25, %v1345_v61  ;;  %v787_v39 = vmul.f32 %v784_v24, %v1332_v57 }
 0x2d9   : > { %v757_v26 = vpop.permute.xlu1 %756 }
 0x2da   : > { %v759_v27 = vpop.permute.xlu0 %758  ;;  %v828_v50 = vrot.slane %v786_v38, 4  ;;  %v829_v51 = vrot.slane %v787_v39, 4 }
 0x2db   : > { %v760_v34 = vsel %vm491_vm5, %v757_v26, %v759_v27  ;;  %v761_v35 = vsel %vm491_vm5, %v759_v27, %v757_v26 }
 0x2dc   : > { %v762_v33 = vmul.f32 %v761_v35, %v1336_v58  ;;  %v763_v42 = vmul.f32 %v760_v34, %v1339_v59 }
 0x2dd   : > { %v773_v40 = vpop.permute.xlu1 %772 }
 0x2de   : > { %v775_v44 = vpop.permute.xlu0 %774  ;;  %v844_v58 = vsel %vm479_vm1, %v762_v33, %v822_v46  ;;  %v845_v55 = vsel %vm479_vm1, %v763_v42, %v823_v49 }
 0x2df   : > { %v776_v53 = vsel %vm534_vm3, %v773_v40, %v775_v44  ;;  %v777_v47 = vsel %vm534_vm3, %v775_v44, %v773_v40 }
 0x2e0   : > { %v778_v61 = vmul.f32 %v777_v47, %v1367_v11  ;;  %v779_v57 = vmul.f32 %v776_v53, %v1342_v60 }
 0x2e1   : > { %v789_v52 = vpop.permute.xlu1 %788 }
 0x2e2   : > { %v846_v59 = vsel %vm479_vm1, %v778_v61, %v828_v50  ;;  %v791_v54 = vpop.permute.xlu0 %790  ;;  %v847_v56 = vsel %vm479_vm1, %v779_v57, %v829_v51 }
 0x2e3   : > { %v792_v62 = vsel %vm578_vm6, %v789_v52, %v791_v54  ;;  %v793_v63 = vsel %vm578_vm6, %v791_v54, %v789_v52  ;;  %v1079_v31 = vpack.c.bf16 %v847_v56, %v845_v55  ;;  %v1081_v11 = vpack.c.bf16 %v846_v59, %v844_v58 }
 0x2e4   : > { %v794_v45 = vmul.f32 %v792_v62, %v1374_v19  ;;  %v795_v2 = vmul.f32 %v793_v63, %v1350_v1 }
 0x2e5   : > { %1080 = vmatprep.subr.bf16.mxu0 %v1079_v31  ;;  %v805_v60 = vpop.permute.xlu1 %804 }
 0x2e6   : > { %v807_v3 = vpop.permute.xlu0 %806  ;;  %1082 = vmatpush1.bf16.msra.mxu0 %v1081_v11  ;;  %v834_v8 = vrot.slane %v794_v45, 4  ;;  %v835_v9 = vrot.slane %v795_v2, 4 }
 0x2e7   : > { %v808_v4 = vsel %vm622_vm8, %v805_v60, %v807_v3  ;;  %v809_v43 = vsel %vm622_vm8, %v807_v3, %v805_v60 }
 0x2e8   : > { %v810_v5 = vmul.f32 %v808_v4, %v1399_v36  ;;  %v811_v6 = vmul.f32 %v809_v43, %v1402_v37  ;;  %v848_v36 = vsel %vm479_vm1, %v1436_v13, %v834_v8  ;;  %v849_v21 = vsel %vm479_vm1, %v1438_v14, %v835_v9  ;;  %v753_v14 = vld [vmem:[%s1556_s7] sm:$0xf] }
 0x2e9   : > { %v797_v7 = vpop.permute.xlu1 %796 }
 0x2ea   : > { %v799_v10 = vpop.permute.xlu0 %798  ;;  %v840_v12 = vrot.slane %v810_v5, 4  ;;  %v841_v15 = vrot.slane %v811_v6, 4 }
 0x2eb   : > { %v800_v19 = vsel %vm600_vm7, %v797_v7, %v799_v10  ;;  %v801_v1 = vsel %vm600_vm7, %v799_v10, %v797_v7 }
 0x2ec   : > { %v802_v16 = vmul.f32 %v800_v19, %v1391_v30  ;;  %v803_v17 = vmul.f32 %v801_v1, %v1394_v32 }
 0x2ed   : > { %v813_v18 = vpop.permute.xlu1 %812 }
 0x2ee   : > { %v850_v37 = vsel %vm479_vm1, %v802_v16, %v840_v12  ;;  %v815_v20 = vpop.permute.xlu0 %814  ;;  %v851_v22 = vsel %vm479_vm1, %v803_v17, %v841_v15 }
 0x2ef   : > { %v817_v23 = vsel %vm644_vm9, %v815_v20, %v813_v18  ;;  %v1083_v24 = vpack.c.bf16 %v851_v22, %v849_v21  ;;  %v1085_v25 = vpack.c.bf16 %v850_v37, %v848_v36  ;;  %v816_v32 = vsel %vm644_vm9, %v813_v18, %v815_v20 }
 0x2f0   : > { %v819_v30 = vmul.f32 %v817_v23, %v1418_v48  ;;  %v818_v13 = vmul.f32 %v816_v32, %v1425_v0 }
 0x2f1   : > { %1084 = vmatprep.subr.bf16.mxu0 %v1083_v24 }
 0x2f2   : > { %1086 = vmatpush1.bf16.msra.mxu0 %v1085_v25 }
 0x2f3   : > { %1040 = vmatprep.subr.msk.mxu0 %vm479_vm1, %v819_v30 }
 0x2f6   : > { %1041 = vmatpush1.msk.msra.mxu0 %vm479_vm1, %v818_v13 }
 0x2f7   : > { %1042 = vmatmul.mubr.msk.f32.vlgmr.msra.gmra.mrb[2].mxu0 %vm852_vm11, %v753_v14 }
 0x2fe   : > { %v936_v26 = vpop.permute.xlu1 %935 }
 0x2ff   : > { %v943_v28 = vpop.permute.xlu0 %942 }
 0x3ca   : > { %v928_v48 = vpop.f32.mrb[2].mxu0 }
 0x3cb   : > { %v938_v27 = vmul.f32 %v936_v26, %v928_v48  ;;  %v930_v41 = vpop.f32.mrb[3].mxu0 }
 0x3cc   : > { %v939_v29 = vmul.f32 %v936_v26, %v930_v41 }
 0x3cd   : > { %v945_v34 = vadd.f32 %v943_v28, %v938_v27 }
 0x3ce   : > { %v946_v35 = vadd.f32 %v943_v28, %v939_v29 }
 0x3cf   : > { %v947_v38 = vmax.f32 %v945_v34, 0.0 }
 0x3d0   : > { %v948_v39 = vmax.f32 %v946_v35, 0.0 }
 0x3d2   : > { %v951_v0 = vcombine.low %v947_v38, %v948_v39 }
 0x3d4   : > { %953 = vst [vmem:[%s376_s11] sm:$0xff] %v951_v0 }
 0x3d5 PF: > { %s20_s13 = sadd.s32 1, %s1114_s13  }
 0x3d6   : > { %p17_p4 = scmp.ge.s32.totalorder %s20_s13, 4  }
 0x3d8   :  { %19 = sbr.rel (!%p17_p4) target bundleno = 1 (0x1), region = 100 }

</bundles_post_ra>
